<compile_context>
chip_gen: v5e
topology: v5e:2x2
jax: 0.10.0
libtpu: 0.0.40
codegen_flags: <defaults>
</compile_context>

<pallas_src>
import math
import functools
from typing import NamedTuple

import jax
import jax.numpy as jnp
from jax.experimental import pallas as pl
from jax.experimental.pallas import tpu as pltpu


def _round_up(n, m):
    return ((n + m - 1) // m) * m


class GRUParams(NamedTuple):
    """Pre-transposed, per-gate lane-padded parameters (built once)."""
    w_i: jax.Array    # (Ip, 3*Hp)  columns laid out [r | z | n], each Hp wide
    w_h: jax.Array    # (Hp, 3*Hp)
    b_rz: jax.Array   # (1, 2*Hp)   b_ih_r+b_hh_r | b_ih_z+b_hh_z  (f32)
    b_in: jax.Array   # (1, Hp)     b_ih_n                          (f32)
    b_hn: jax.Array   # (1, Hp)     b_hh_n                          (f32)


def prepare_gru_params(weight_ih, weight_hh, bias_ih=None, bias_hh=None):
    """Call ONCE at parameter setup (not per timestep).

    weight_ih: (3H, I), weight_hh: (3H, H), biases: (3H,) -- PyTorch layout.
    """
    H3, I = weight_ih.shape
    H = H3 // 3
    assert weight_hh.shape == (3 * H, H)
    dtype = weight_ih.dtype
    if bias_ih is None:
        bias_ih = jnp.zeros((3 * H,), dtype)
    if bias_hh is None:
        bias_hh = jnp.zeros((3 * H,), dtype)

    Ip = _round_up(I, 128)   # lane-dense contraction dim for x
    Hp = _round_up(H, 128)   # lane-dense per-gate output width

    def pack_weight(w, K, Kp):
        # (3H, K) torch layout -> transposed (Kp, 3*Hp); gate g occupies
        # columns [g*Hp, g*Hp + H). Zero padding keeps padded rows/cols inert.
        w_t = w.T  # (K, 3H)
        out = jnp.zeros((Kp, 3 * Hp), dtype)
        for g in range(3):
            out = out.at[:K, g * Hp:g * Hp + H].set(w_t[:, g * H:(g + 1) * H])
        return out

    w_i = pack_weight(weight_ih, I, Ip)
    w_h = pack_weight(weight_hh, H, Hp)

    def pad_bias(b):  # (H,) -> (1, Hp) f32 (added to the f32 accumulator)
        return jnp.zeros((1, Hp), jnp.float32).at[0, :H].set(b.astype(jnp.float32))

    b_rz = jnp.concatenate(
        [pad_bias(bias_ih[:H] + bias_hh[:H]),
         pad_bias(bias_ih[H:2 * H] + bias_hh[H:2 * H])], axis=1)  # (1, 2Hp)
    b_in = pad_bias(bias_ih[2 * H:])
    b_hn = pad_bias(bias_hh[2 * H:])
    return GRUParams(w_i, w_h, b_rz, b_in, b_hn)


def _gru_seq_kernel(x_ref, h0_ref, w_i_ref, w_h_ref, b_rz_ref, b_in_ref,
                    b_hn_ref, out_ref, h_state, *, hidden_pad):
    """One timestep per grid point; hidden state carried in VMEM scratch."""
    Hp = hidden_pad
    t = pl.program_id(1)

    @pl.when(t == 0)
    def _():  # (re)initialize the carried hidden state for this batch block
        h_state[...] = h0_ref[...].astype(jnp.float32)

    x = x_ref[...]                               # (bb, Ip), native dtype
    h = h_state[...]                             # (bb, Hp), f32
    h_mm = h.astype(w_h_ref.dtype)               # no-op for f32 params

    # Two MXU matmuls produce all three gates; gate blocks are 128-aligned.
    gi = jnp.dot(x, w_i_ref[...], preferred_element_type=jnp.float32)     # (bb, 3Hp)
    gh = jnp.dot(h_mm, w_h_ref[...], preferred_element_type=jnp.float32)  # (bb, 3Hp)

    g_rz = gi[:, :2 * Hp] + gh[:, :2 * Hp] + b_rz_ref[...]
    r = jax.nn.sigmoid(g_rz[:, :Hp])
    z = jax.nn.sigmoid(g_rz[:, Hp:])
    n = jnp.tanh(gi[:, 2 * Hp:] + b_in_ref[...] + r * (gh[:, 2 * Hp:] + b_hn_ref[...]))
    h_new = n + z * (h - n)

    h_state[...] = h_new
    out_ref[...] = h_new.astype(out_ref.dtype)


def gru_sequence(xs, h0, params: GRUParams, *, batch_block=None):
    """Run the GRU over a whole sequence in a single pallas_call.

    xs: (T, B, I), h0: (B, H) -> (T, B, H) hidden states.
    """
    T, B, I = xs.shape
    H = h0.shape[1]
    Ip, three_hp = params.w_i.shape
    Hp = three_hp // 3
    assert params.w_h.shape == (Hp, 3 * Hp)
    assert I <= Ip and H <= Hp
    dtype = xs.dtype

    if batch_block is None:
        # Fill sublanes; feed taller LHS tiles to the MXU for bigger batches.
        batch_block = min(_round_up(B, 8), 128)
    Bp = _round_up(B, batch_block)   # padded rows are inert (zeros)
    xs_p = jnp.zeros((T, Bp, Ip), dtype).at[:, :B, :I].set(xs)
    h0_p = jnp.zeros((Bp, Hp), dtype).at[:B, :H].set(h0.astype(dtype))

    const = lambda bi, t: (0, 0)
    out = pl.pallas_call(
        functools.partial(_gru_seq_kernel, hidden_pad=Hp),
        out_shape=jax.ShapeDtypeStruct((T, Bp, Hp), dtype),
        grid=(Bp // batch_block, T),
        in_specs=[
            pl.BlockSpec((None, batch_block, Ip), lambda bi, t: (t, bi, 0)),  # xs
            pl.BlockSpec((batch_block, Hp), lambda bi, t: (bi, 0)),           # h0
            # Constant index_maps: weights/biases DMA'd once, VMEM-resident.
            pl.BlockSpec((Ip, 3 * Hp), const),                                # w_i
            pl.BlockSpec((Hp, 3 * Hp), const),                                # w_h
            pl.BlockSpec((1, 2 * Hp), const),                                 # b_rz
            pl.BlockSpec((1, Hp), const),                                     # b_in
            pl.BlockSpec((1, Hp), const),                                     # b_hn
        ],
        out_specs=pl.BlockSpec((None, batch_block, Hp), lambda bi, t: (t, bi, 0)),
        scratch_shapes=[pltpu.VMEM((batch_block, Hp), jnp.float32)],
        compiler_params=pltpu.CompilerParams(
            # batch blocks are independent -> shard across v7x TensorCores;
            # time carries the recurrence -> "arbitrary".
            dimension_semantics=("parallel", "arbitrary"),
        ),
        # TODO(synk): for production I/H (e.g. 2048) tile the 3*Hp weight
        # columns with a grid axis (512-lane tiles) and set vmem_limit_bytes;
        # full-array weight blocks here are fine only because shapes are tiny.
    )(xs_p, h0_p, params.w_i, params.w_h, params.b_rz, params.b_in, params.b_hn)
    return out[:, :B, :H]


def gru_cell_prepared(x, hx, params: GRUParams):
    """Single GRUCell step (module forward) with pre-prepared params."""
    return gru_sequence(x[None], hx, params)[0]


def gru_cell(x, hx, weight_ih, weight_hh, bias_ih=None, bias_hh=None):
    """Module-faithful convenience wrapper (prepares params internally)."""
    params = prepare_gru_params(weight_ih, weight_hh, bias_ih, bias_hh)
    return gru_cell_prepared(x, hx, params)


# ----------------------------- pure-JAX reference ---------------------------

def _reference_gru_cell(x, hx, weight_ih, weight_hh, bias_ih, bias_hh):
    H = hx.shape[1]
    gi = x @ weight_ih.T + bias_ih
    gh = hx @ weight_hh.T + bias_hh
    i_r, i_z, i_n = gi[:, :H], gi[:, H:2 * H], gi[:, 2 * H:]
    h_r, h_z, h_n = gh[:, :H], gh[:, H:2 * H], gh[:, 2 * H:]
    r = jax.nn.sigmoid(i_r + h_r)
    z = jax.nn.sigmoid(i_z + h_z)
    n = jnp.tanh(i_n + r * h_n)
    return n + z * (hx - n)


def _reference_gru_sequence(xs, h0, weight_ih, weight_hh, bias_ih, bias_hh):
    h = h0
    outs = []
    for t in range(xs.shape[0]):
        h = _reference_gru_cell(xs[t], h, weight_ih, weight_hh, bias_ih, bias_hh)
        outs.append(h)
    return jnp.stack(outs, axis=0)


if __name__ == "__main__":
    batch = 8          # fills all 8 sublanes
    input_size = 16
    hidden_size = 32
    seq_len = 6

    key = jax.random.PRNGKey(0)
    k_xs, k_h0, k_wih, k_whh, k_bih, k_bhh, k_x1, k_h1 = jax.random.split(key, 8)

    # Deterministic param init matching reset_parameters(): U(-stdv, stdv)
    stdv = 1.0 / math.sqrt(hidden_size)
    weight_ih = jax.random.uniform(k_wih, (3 * hidden_size, input_size),
                                   jnp.float32, -stdv, stdv)
    weight_hh = jax.random.uniform(k_whh, (3 * hidden_size, hidden_size),
                                   jnp.float32, -stdv, stdv)
    bias_ih = jax.random.uniform(k_bih, (3 * hidden_size,), jnp.float32, -stdv, stdv)
    bias_hh = jax.random.uniform(k_bhh, (3 * hidden_size,), jnp.float32, -stdv, stdv)

    # Prepare (transpose / per-gate pack / pad) the parameters ONCE.
    params = prepare_gru_params(weight_ih, weight_hh, bias_ih, bias_hh)

    # 1) Single-step forward (module-equivalent); small odd batch exercises
    #    the sublane/lane padding path.
    x1 = jax.random.normal(k_x1, (2, input_size), jnp.float32)
    h1 = jax.random.normal(k_h1, (2, hidden_size), jnp.float32)
    h_new = jax.block_until_ready(gru_cell_prepared(x1, h1, params))
    h_ref = _reference_gru_cell(x1, h1, weight_ih, weight_hh, bias_ih, bias_hh)
    assert h_new.shape == (2, hidden_size)
    assert jnp.allclose(h_new, h_ref, atol=2e-5, rtol=1e-4), "single-step mismatch"

    # 2) Whole sequence driven by one pallas_call (weights resident in VMEM,
    #    recurrence carried in a VMEM scratch).
    xs = jax.random.normal(k_xs, (seq_len, batch, input_size), jnp.float32)
    h0 = jax.random.normal(k_h0, (batch, hidden_size), jnp.float32)
    hs = jax.block_until_ready(gru_sequence(xs, h0, params))
    hs_ref = _reference_gru_sequence(xs, h0, weight_ih, weight_hh, bias_ih, bias_hh)
    assert hs.shape == (seq_len, batch, hidden_size)
    assert jnp.allclose(hs, hs_ref, atol=1e-4, rtol=1e-4), "sequence mismatch"

    print("KERNEL_OK")
</pallas_src>

<mosaic_0001>
module attributes {stable_mosaic.version = 11 : i64} {
  func.func @_gru_seq_kernel(%arg0: i32, %arg1: i32, %arg2: memref<1x8x128xf32, #tpu.memory_space<vmem>>, %arg3: memref<8x128xf32, #tpu.memory_space<vmem>>, %arg4: memref<128x384xf32, #tpu.memory_space<vmem>>, %arg5: memref<128x384xf32, #tpu.memory_space<vmem>>, %arg6: memref<1x256xf32, #tpu.memory_space<vmem>>, %arg7: memref<1x128xf32, #tpu.memory_space<vmem>>, %arg8: memref<1x128xf32, #tpu.memory_space<vmem>>, %arg9: memref<1x8x128xf32, #tpu.memory_space<vmem>>, %arg10: memref<8x128xf32, #tpu.memory_space<vmem>>) attributes {dimension_semantics = [#tpu.dimension_semantics<parallel>, #tpu.dimension_semantics<arbitrary>], iteration_bounds = array<i64: 1, 1>, scalar_prefetch = 0 : i64, scratch_operands = 1 : i64, tpu.core_type = #tpu.core_type<tc>, window_params = [{transform_indices = @transform_0, window_bounds = array<i64: 1, 8, 128>}, {transform_indices = @transform_1, window_bounds = array<i64: 8, 128>}, {pipeline_mode = #tpu.pipeline_mode<synchronous>, transform_indices = @transform_2, window_bounds = array<i64: 128, 384>}, {pipeline_mode = #tpu.pipeline_mode<synchronous>, transform_indices = @transform_3, window_bounds = array<i64: 128, 384>}, {pipeline_mode = #tpu.pipeline_mode<synchronous>, transform_indices = @transform_4, window_bounds = array<i64: 1, 256>}, {pipeline_mode = #tpu.pipeline_mode<synchronous>, transform_indices = @transform_5, window_bounds = array<i64: 1, 128>}, {pipeline_mode = #tpu.pipeline_mode<synchronous>, transform_indices = @transform_6, window_bounds = array<i64: 1, 128>}, {transform_indices = @transform_7, window_bounds = array<i64: 1, 8, 128>}]} {
    %c0_i32 = arith.constant 0 : i32
    %0 = arith.cmpi eq, %arg1, %c0_i32 : i32
    %1 = arith.extui %0 : i1 to i32
    %c0_i32_0 = arith.constant 0 : i32
    %2 = arith.cmpi ne, %1, %c0_i32_0 : i32
    scf.if %2 {
      %c0_23 = arith.constant 0 : index
      %c0_24 = arith.constant 0 : index
      %46 = vector.load %arg3[%c0_23, %c0_24] : memref<8x128xf32, #tpu.memory_space<vmem>>, vector<8x128xf32>
      %c0_25 = arith.constant 0 : index
      %c0_26 = arith.constant 0 : index
      %47 = vector.load %arg10[%c0_25, %c0_26] : memref<8x128xf32, #tpu.memory_space<vmem>>, vector<8x128xf32>
      tpu.vector_store %arg10[%c0_25, %c0_26], %46 {strides = array<i32>} : memref<8x128xf32, #tpu.memory_space<vmem>>, vector<8x128xf32>,
    } else {
    }
    %c0 = arith.constant 0 : index
    %c0_1 = arith.constant 0 : index
    %c0_2 = arith.constant 0 : index
    %3 = vector.load %arg2[%c0, %c0_1, %c0_2] : memref<1x8x128xf32, #tpu.memory_space<vmem>>, vector<1x8x128xf32>
    %4 = vector.shape_cast %3 : vector<1x8x128xf32> to vector<8x128xf32>
    %c0_3 = arith.constant 0 : index
    %c0_4 = arith.constant 0 : index
    %5 = vector.load %arg10[%c0_3, %c0_4] : memref<8x128xf32, #tpu.memory_space<vmem>>, vector<8x128xf32>
    %c0_5 = arith.constant 0 : index
    %c0_6 = arith.constant 0 : index
    %6 = vector.load %arg4[%c0_5, %c0_6] : memref<128x384xf32, #tpu.memory_space<vmem>>, vector<128x384xf32>
    %cst = arith.constant dense<0.000000e+00> : vector<8x384xf32>
    %7 = tpu.matmul %4, %6, %cst {dimension_numbers = #tpu.dot_dimension_numbers<[1], [0], [0], [1], [0, 0, 1, 1], [], []>} : vector<8x128xf32>, vector<128x384xf32>, vector<8x384xf32> -> vector<8x384xf32>
    %c0_7 = arith.constant 0 : index
    %c0_8 = arith.constant 0 : index
    %8 = vector.load %arg5[%c0_7, %c0_8] : memref<128x384xf32, #tpu.memory_space<vmem>>, vector<128x384xf32>
    %cst_9 = arith.constant dense<0.000000e+00> : vector<8x384xf32>
    %9 = tpu.matmul %5, %8, %cst_9 {dimension_numbers = #tpu.dot_dimension_numbers<[1], [0], [0], [1], [0, 0, 1, 1], [], []>} : vector<8x128xf32>, vector<128x384xf32>, vector<8x384xf32> -> vector<8x384xf32>
    %10 = vector.extract_strided_slice %7 {offsets = [0, 0], sizes = [8, 256], strides = [1, 1]} : vector<8x384xf32> to vector<8x256xf32>
    %11 = vector.extract_strided_slice %9 {offsets = [0, 0], sizes = [8, 256], strides = [1, 1]} : vector<8x384xf32> to vector<8x256xf32>
    %12 = arith.addf %10, %11 : vector<8x256xf32>
    %c0_10 = arith.constant 0 : index
    %c0_11 = arith.constant 0 : index
    %13 = vector.load %arg6[%c0_10, %c0_11] : memref<1x256xf32, #tpu.memory_space<vmem>>, vector<1x256xf32>
    %14 = vector.broadcast %13 : vector<1x256xf32> to vector<8x256xf32>
    %15 = arith.addf %12, %14 : vector<8x256xf32>
    %16 = vector.extract_strided_slice %15 {offsets = [0, 0], sizes = [8, 128], strides = [1, 1]} : vector<8x256xf32> to vector<8x128xf32>
    %17 = arith.negf %16 : vector<8x128xf32>
    %18 = math.exp %17 : vector<8x128xf32>
    %cst_12 = arith.constant 1.000000e+00 : f32
    %19 = vector.broadcast %cst_12 : f32 to vector<8x128xf32>
    %20 = arith.addf %19, %18 : vector<8x128xf32>
    %21 = arith.divf %19, %20 : vector<8x128xf32>
    %22 = vector.extract_strided_slice %15 {offsets = [0, 128], sizes = [8, 128], strides = [1, 1]} : vector<8x256xf32> to vector<8x128xf32>
    %23 = arith.negf %22 : vector<8x128xf32>
    %24 = math.exp %23 : vector<8x128xf32>
    %cst_13 = arith.constant 1.000000e+00 : f32
    %25 = vector.broadcast %cst_13 : f32 to vector<8x128xf32>
    %26 = arith.addf %25, %24 : vector<8x128xf32>
    %27 = arith.divf %25, %26 : vector<8x128xf32>
    %28 = vector.extract_strided_slice %7 {offsets = [0, 256], sizes = [8, 128], strides = [1, 1]} : vector<8x384xf32> to vector<8x128xf32>
    %c0_14 = arith.constant 0 : index
    %c0_15 = arith.constant 0 : index
    %29 = vector.load %arg7[%c0_14, %c0_15] : memref<1x128xf32, #tpu.memory_space<vmem>>, vector<1x128xf32>
    %30 = vector.broadcast %29 : vector<1x128xf32> to vector<8x128xf32>
    %31 = arith.addf %28, %30 : vector<8x128xf32>
    %32 = vector.extract_strided_slice %9 {offsets = [0, 256], sizes = [8, 128], strides = [1, 1]} : vector<8x384xf32> to vector<8x128xf32>
    %c0_16 = arith.constant 0 : index
    %c0_17 = arith.constant 0 : index
    %33 = vector.load %arg8[%c0_16, %c0_17] : memref<1x128xf32, #tpu.memory_space<vmem>>, vector<1x128xf32>
    %34 = vector.broadcast %33 : vector<1x128xf32> to vector<8x128xf32>
    %35 = arith.addf %32, %34 : vector<8x128xf32>
    %36 = arith.mulf %21, %35 : vector<8x128xf32>
    %37 = arith.addf %31, %36 : vector<8x128xf32>
    %38 = math.tanh %37 : vector<8x128xf32>
    %39 = arith.subf %5, %38 : vector<8x128xf32>
    %40 = arith.mulf %27, %39 : vector<8x128xf32>
    %41 = arith.addf %38, %40 : vector<8x128xf32>
    %c0_18 = arith.constant 0 : index
    %c0_19 = arith.constant 0 : index
    %42 = vector.load %arg10[%c0_18, %c0_19] : memref<8x128xf32, #tpu.memory_space<vmem>>, vector<8x128xf32>
    tpu.vector_store %arg10[%c0_18, %c0_19], %41 {strides = array<i32>} : memref<8x128xf32, #tpu.memory_space<vmem>>, vector<8x128xf32>,
    %c0_20 = arith.constant 0 : index
    %c0_21 = arith.constant 0 : index
    %c0_22 = arith.constant 0 : index
    %43 = vector.load %arg9[%c0_20, %c0_21, %c0_22] : memref<1x8x128xf32, #tpu.memory_space<vmem>>, vector<1x8x128xf32>
    %44 = vector.shape_cast %43 : vector<1x8x128xf32> to vector<8x128xf32>
    %45 = vector.shape_cast %41 : vector<8x128xf32> to vector<1x8x128xf32>
    tpu.vector_store %arg9[%c0_20, %c0_21, %c0_22], %45 {strides = array<i32>} : memref<1x8x128xf32, #tpu.memory_space<vmem>>, vector<1x8x128xf32>,
    return
  }
  func.func @transform_0(%arg0: i32, %arg1: i32) -> (i32, i32, i32) {
    %c0_i32 = arith.constant 0 : i32
    %c0_i32_0 = arith.constant 0 : i32
    return %arg1, %arg0, %c0_i32 : i32, i32, i32
  }
  func.func @transform_1(%arg0: i32, %arg1: i32) -> (i32, i32) {
    %c0_i32 = arith.constant 0 : i32
    %c0_i32_0 = arith.constant 0 : i32
    return %arg0, %c0_i32 : i32, i32
  }
  func.func @transform_2(%arg0: i32, %arg1: i32) -> (i32, i32) {
    %c0_i32 = arith.constant 0 : i32
    %c0_i32_0 = arith.constant 0 : i32
    %c0_i32_1 = arith.constant 0 : i32
    return %c0_i32, %c0_i32_0 : i32, i32
  }
  func.func @transform_3(%arg0: i32, %arg1: i32) -> (i32, i32) {
    %c0_i32 = arith.constant 0 : i32
    %c0_i32_0 = arith.constant 0 : i32
    %c0_i32_1 = arith.constant 0 : i32
    return %c0_i32, %c0_i32_0 : i32, i32
  }
  func.func @transform_4(%arg0: i32, %arg1: i32) -> (i32, i32) {
    %c0_i32 = arith.constant 0 : i32
    %c0_i32_0 = arith.constant 0 : i32
    %c0_i32_1 = arith.constant 0 : i32
    return %c0_i32, %c0_i32_0 : i32, i32
  }
  func.func @transform_5(%arg0: i32, %arg1: i32) -> (i32, i32) {
    %c0_i32 = arith.constant 0 : i32
    %c0_i32_0 = arith.constant 0 : i32
    %c0_i32_1 = arith.constant 0 : i32
    return %c0_i32, %c0_i32_0 : i32, i32
  }
  func.func @transform_6(%arg0: i32, %arg1: i32) -> (i32, i32) {
    %c0_i32 = arith.constant 0 : i32
    %c0_i32_0 = arith.constant 0 : i32
    %c0_i32_1 = arith.constant 0 : i32
    return %c0_i32, %c0_i32_0 : i32, i32
  }
  func.func @transform_7(%arg0: i32, %arg1: i32) -> (i32, i32, i32) {
    %c0_i32 = arith.constant 0 : i32
    %c0_i32_0 = arith.constant 0 : i32
    return %arg1, %arg0, %c0_i32 : i32, i32, i32
  }
}

</mosaic_0001>

<bundles_post_ra>
// kernel: tpu_custom_call.1
= control target key start
LH: loop header
LB: loop body
LE: loop exit
PB: predicated region body
PF: predicated region fallthrough
CT: control target
= control target key end

     0   :  { %12 = vsyncpa [#allocation4], 0  ;;  %s626_s0 = inlined_call_operand.hbm [shape: f32[1,8,128], index: 0, kind: input, shape index: {}]   ;;  %s627_s1 = inlined_call_operand.hbm [shape: f32[8,128], index: 1, kind: input, shape index: {}]   ;;  %s628_s2 = inlined_call_operand.hbm [shape: f32[128,384], index: 2, kind: input, shape index: {}]   ;;  %s629_s3 = inlined_call_operand.hbm [shape: f32[128,384], index: 3, kind: input, shape index: {}]   ;;  %s630_s4 = inlined_call_operand.vmem [shape: f32[1,256], index: 4, kind: input, shape index: {}]   ;;  %s631_s5 = inlined_call_operand.vmem [shape: f32[1,128], index: 5, kind: input, shape index: {}]   ;;  %s632_s6 = inlined_call_operand.vmem [shape: f32[1,128], index: 6, kind: input, shape index: {}]   ;;  %s633_s7 = inlined_call_operand.hbm [shape: f32[1,8,128], index: 7, kind: output, shape index: {}]  }
   0x1   :  { %13 = vsyncpa [#allocation7], 0 }
   0x2   :  { %14 = vsyncpa [#allocation10], 0  ;;  %s32_s26 = sshll.u32 %s627_s1, 4  ;;  %s33_s26 = int_to_ptr.hbm [resolvable:$true] %s32_s26 }
   0x3   :  { %15 = vsyncpa [#allocation5], 0  ;;  %s544_s27 = smov [#allocation6]   ;;  %s21_s8 = sshll.u32 %s626_s0, 4  ;;  %s22_s8 = int_to_ptr.hbm [resolvable:$true] %s21_s8 }
   0x4   :  { %s34_s28 = sshll.u32 %s544_s27, 4  ;;  %s545_s9 = smov [#allocation3]   ;;  %s35_s28 = int_to_ptr.vmem [resolvable:$true] %s34_s28 }
   0x5   :  { %37 = dma.hbm_to_vmem [thread:$0]  %s33_s26, 128, %s35_s28, [#allocation7]  }
   0x6   :  { %s23_s10 = sshll.u32 %s545_s9, 4  ;;  %s42_s13 = sshll.u32 %s628_s2, 4  ;;  %s24_s10 = int_to_ptr.vmem [resolvable:$true] %s23_s10  ;;  %s43_s13 = int_to_ptr.hbm [resolvable:$true] %s42_s13 }
   0x7   :  { %26 = dma.hbm_to_vmem [thread:$0]  %s22_s8, 128, %s24_s10, [#allocation4]  }
   0x8   :  { %s546_s1 = smov [#allocation8]   ;;  %s55_s17 = sshll.u32 %s629_s3, 4  ;;  %s56_s17 = int_to_ptr.hbm [resolvable:$true] %s55_s17 }
   0x9   :  { %s44_s14 = sshll.u32 %s546_s1, 4  ;;  %s547_s18 = smov 384   ;;  %s45_s14 = int_to_ptr.vmem [resolvable:$true] %s44_s14 }
   0xa   :  { %s548_s0 = smov 24   ;;  %s549_s19 = smov [#allocation9]  }
   0xb   :  { %50 = dma.hbm_to_vmem [thread:$0]  %s43_s13, 6144, %s45_s14, [#allocation7], %s547_s18, %s547_s18, %s548_s0  }
   0xc   :  { %s57_s20 = sshll.u32 %s549_s19, 4  ;;  %s58_s20 = int_to_ptr.vmem [resolvable:$true] %s57_s20 }
   0xd   :  { %63 = dma.hbm_to_vmem [thread:$0]  %s56_s17, 6144, %s58_s20, [#allocation10], %s547_s18, %s547_s18, %s548_s0  }
   0xe   :  { %536 = dma.done.wait [#allocation4], 128  }
   0xf   :  { %537 = vsyncadd [#allocation4], 4294967168 }
  0x10   :  { %538 = dma.done.wait [#allocation7], 6272  }
  0x11   :  { %539 = vsyncadd [#allocation7], 4294961024 }
  0x12   :  { %540 = dma.done.wait [#allocation10], 6144  }
  0x13   :  { %541 = vsyncadd [#allocation10], 4294961152  ;;  %v139_v0 = vld [vmem:[#allocation8 + $0x168] sm:$0xff]  ;;  %v136_v2 = vld [vmem:[#allocation8 + $0x150] sm:$0xff]  ;;  %s383_s26 = sshll.u32 %s633_s7, 4  ;;  %s384_s26 = int_to_ptr.hbm [resolvable:$true] %s383_s26 }
  0x14   :  { %v247_v1 = vld [vmem:[#allocation9 + $0x168] sm:$0xff]  ;;  %142 = vmatpush.msra.mxu0 %v139_v0  ;;  %v244_v3 = vld [vmem:[#allocation9 + $0x150] sm:$0xff]  ;;  %v133_v4 = vld [vmem:[#allocation8 + $0x138] sm:$0xff] }
  0x15   :  { %250 = vmatpush.msra.mxu3 %v247_v1  ;;  %v241_v5 = vld [vmem:[#allocation9 + $0x138] sm:$0xff]  ;;  %v140_v6 = vld [vmem:[#allocation8 + $0x170] sm:$0xff]  ;;  %v130_v8 = vld [vmem:[#allocation8 + $0x120] sm:$0xff] }
  0x16   :  { %143 = vmatpush.msra.mxu0 %v136_v2  ;;  %v137_v7 = vld [vmem:[#allocation8 + $0x158] sm:$0xff]  ;;  %162 = vmatpush.msra.mxu1 %v140_v6  ;;  %v238_v9 = vld [vmem:[#allocation9 + $0x120] sm:$0xff]  ;;  %v127_v11 = vld [vmem:[#allocation8 + $0x108] sm:$0xff] }
  0x17   :  { %251 = vmatpush.msra.mxu3 %v244_v3  ;;  %v134_v10 = vld [vmem:[#allocation8 + $0x140] sm:$0xff]  ;;  %v235_v12 = vld [vmem:[#allocation9 + $0x108] sm:$0xff]  ;;  %v124_v14 = vld [vmem:[#allocation8 + $0xf0] sm:$0xff] }
  0x18   :  { %144 = vmatpush.msra.mxu0 %v133_v4  ;;  %163 = vmatpush.msra.mxu1 %v137_v7  ;;  %v131_v13 = vld [vmem:[#allocation8 + $0x128] sm:$0xff]  ;;  %v232_v15 = vld [vmem:[#allocation9 + $0xf0] sm:$0xff]  ;;  %v121_v17 = vld [vmem:[#allocation8 + $0xd8] sm:$0xff] }
  0x19   :  { %252 = vmatpush.msra.mxu3 %v241_v5  ;;  %v128_v16 = vld [vmem:[#allocation8 + $0x110] sm:$0xff]  ;;  %v229_v18 = vld [vmem:[#allocation9 + $0xd8] sm:$0xff]  ;;  %v118_v20 = vld [vmem:[#allocation8 + $0xc0] sm:$0xff] }
  0x1a   :  { %145 = vmatpush.msra.mxu0 %v130_v8  ;;  %164 = vmatpush.msra.mxu1 %v134_v10  ;;  %v125_v19 = vld [vmem:[#allocation8 + $0xf8] sm:$0xff]  ;;  %v226_v21 = vld [vmem:[#allocation9 + $0xc0] sm:$0xff]  ;;  %v115_v23 = vld [vmem:[#allocation8 + $0xa8] sm:$0xff] }
  0x1b   :  { %253 = vmatpush.msra.mxu3 %v238_v9  ;;  %v122_v22 = vld [vmem:[#allocation8 + $0xe0] sm:$0xff]  ;;  %v223_v24 = vld [vmem:[#allocation9 + $0xa8] sm:$0xff]  ;;  %v112_v26 = vld [vmem:[#allocation8 + $0x90] sm:$0xff] }
  0x1c   :  { %146 = vmatpush.msra.mxu0 %v127_v11  ;;  %165 = vmatpush.msra.mxu1 %v131_v13  ;;  %v119_v25 = vld [vmem:[#allocation8 + $0xc8] sm:$0xff]  ;;  %v220_v27 = vld [vmem:[#allocation9 + $0x90] sm:$0xff]  ;;  %v141_v28 = vld [vmem:[#allocation8 + $0x178] sm:$0xff] }
  0x1d   :  { %254 = vmatpush.msra.mxu3 %v235_v12  ;;  %v116_v29 = vld [vmem:[#allocation8 + $0xb0] sm:$0xff]  ;;  %v138_v30 = vld [vmem:[#allocation8 + $0x160] sm:$0xff]  ;;  %v109_v31 = vld [vmem:[#allocation8 + $0x78] sm:$0xff]  ;;  %182 = vmatpush.msra.mxu2 %v141_v28 }
  0x1e   :  { %147 = vmatpush.msra.mxu0 %v124_v14  ;;  %166 = vmatpush.msra.mxu1 %v128_v16  ;;  %v217_v32 = vld [vmem:[#allocation9 + $0x78] sm:$0xff]  ;;  %v135_v34 = vld [vmem:[#allocation8 + $0x148] sm:$0xff]  ;;  %v106_v35 = vld [vmem:[#allocation8 + $0x60] sm:$0xff] }
  0x1f   :  { %255 = vmatpush.msra.mxu3 %v232_v15  ;;  %v113_v33 = vld [vmem:[#allocation8 + $0x98] sm:$0xff]  ;;  %v214_v36 = vld [vmem:[#allocation9 + $0x60] sm:$0xff]  ;;  %183 = vmatpush.msra.mxu2 %v138_v30  ;;  %v132_v38 = vld [vmem:[#allocation8 + $0x130] sm:$0xff] }
  0x20   :  { %148 = vmatpush.msra.mxu0 %v121_v17  ;;  %167 = vmatpush.msra.mxu1 %v125_v19  ;;  %v110_v37 = vld [vmem:[#allocation8 + $0x80] sm:$0xff]  ;;  %v103_v39 = vld [vmem:[#allocation8 + $0x48] sm:$0xff]  ;;  %v129_v42 = vld [vmem:[#allocation8 + $0x118] sm:$0xff] }
  0x21   :  { %256 = vmatpush.msra.mxu3 %v229_v18  ;;  %v211_v40 = vld [vmem:[#allocation9 + $0x48] sm:$0xff]  ;;  %184 = vmatpush.msra.mxu2 %v135_v34  ;;  %v100_v43 = vld [vmem:[#allocation8 + $0x30] sm:$0xff]  ;;  %v126_v46 = vld [vmem:[#allocation8 + $0x100] sm:$0xff] }
  0x22   :  { %149 = vmatpush.msra.mxu0 %v118_v20  ;;  %168 = vmatpush.msra.mxu1 %v122_v22  ;;  %v107_v41 = vld [vmem:[#allocation8 + $0x68] sm:$0xff]  ;;  %v208_v44 = vld [vmem:[#allocation9 + $0x30] sm:$0xff]  ;;  %v97_v47 = vld [vmem:[#allocation8 + $0x18] sm:$0xff] }
  0x23   :  { %257 = vmatpush.msra.mxu3 %v226_v21  ;;  %185 = vmatpush.msra.mxu2 %v132_v38  ;;  %v104_v45 = vld [vmem:[#allocation8 + $0x50] sm:$0xff]  ;;  %v205_v48 = vld [vmem:[#allocation9 + $0x18] sm:$0xff]  ;;  %v123_v50 = vld [vmem:[#allocation8 + $0xe8] sm:$0xff] }
  0x24   :  { %150 = vmatpush.msra.mxu0 %v115_v23  ;;  %169 = vmatpush.msra.mxu1 %v119_v25  ;;  %v101_v49 = vld [vmem:[#allocation8 + $0x38] sm:$0xff]  ;;  %v94_v51 = vld [vmem:[#allocation8] sm:$0xff]  ;;  %v248_v54 = vld [vmem:[#allocation9 + $0x170] sm:$0xff] }
  0x25   :  { %258 = vmatpush.msra.mxu3 %v223_v24  ;;  %186 = vmatpush.msra.mxu2 %v129_v42  ;;  %v202_v52 = vld [vmem:[#allocation9] sm:$0xff]  ;;  %v603_v53 = vld [vmem:[#allocation6] sm:$0xff]  ;;  %v605_v56 = vld [vmem:[#allocation3] sm:$0xff] }
  0x26   :  { %151 = vmatpush.msra.mxu0 %v112_v26  ;;  %170 = vmatpush.msra.mxu1 %v116_v29  ;;  %v98_v55 = vld [vmem:[#allocation8 + $0x20] sm:$0xff]  ;;  %v245_v57 = vld [vmem:[#allocation9 + $0x158] sm:$0xff]  ;;  %v120_v58 = vld [vmem:[#allocation8 + $0xd0] sm:$0xff] }
  0x27   :  { %259 = vmatpush.msra.mxu3 %v220_v27  ;;  %187 = vmatpush.msra.mxu2 %v126_v46  ;;  %v95_v59 = vld [vmem:[#allocation8 + $0x8] sm:$0xff]  ;;  %v242_v60 = vld [vmem:[#allocation9 + $0x140] sm:$0xff]  ;;  %v249_v61 = vld [vmem:[#allocation9 + $0x178] sm:$0xff] }
  0x28   :  { %152 = vmatpush.msra.mxu0 %v109_v31  ;;  %171 = vmatpush.msra.mxu1 %v113_v33  ;;  %v117_v62 = vld [vmem:[#allocation8 + $0xb8] sm:$0xff]  ;;  %v239_v63 = vld [vmem:[#allocation9 + $0x128] sm:$0xff]  ;;  %v246_v0 = vld [vmem:[#allocation9 + $0x160] sm:$0xff] }
  0x29   :  { %260 = vmatpush.msra.mxu3 %v217_v32  ;;  %188 = vmatpush.msra.mxu2 %v123_v50  ;;  %v114_v1 = vld [vmem:[#allocation8 + $0xa0] sm:$0xff]  ;;  %v236_v2 = vld [vmem:[#allocation9 + $0x110] sm:$0xff]  ;;  %v243_v3 = vld [vmem:[#allocation9 + $0x148] sm:$0xff] }
  0x2a   :  { %153 = vmatpush.msra.mxu0 %v106_v35  ;;  %172 = vmatpush.msra.mxu1 %v110_v37  ;;  %v111_v4 = vld [vmem:[#allocation8 + $0x88] sm:$0xff]  ;;  %v233_v5 = vld [vmem:[#allocation9 + $0xf8] sm:$0xff]  ;;  %v240_v6 = vld [vmem:[#allocation9 + $0x130] sm:$0xff] }
  0x2b   :  { %261 = vmatpush.msra.mxu3 %v214_v36  ;;  %189 = vmatpush.msra.mxu2 %v120_v58  ;;  %v108_v7 = vld [vmem:[#allocation8 + $0x70] sm:$0xff]  ;;  %v230_v8 = vld [vmem:[#allocation9 + $0xe0] sm:$0xff]  ;;  %v237_v9 = vld [vmem:[#allocation9 + $0x118] sm:$0xff] }
  0x2c   :  { %154 = vmatpush.msra.mxu0 %v103_v39  ;;  %173 = vmatpush.msra.mxu1 %v107_v41  ;;  %v105_v10 = vld [vmem:[#allocation8 + $0x58] sm:$0xff]  ;;  %v227_v11 = vld [vmem:[#allocation9 + $0xc8] sm:$0xff]  ;;  %v234_v12 = vld [vmem:[#allocation9 + $0x100] sm:$0xff] }
  0x2d   :  { %262 = vmatpush.msra.mxu3 %v211_v40  ;;  %190 = vmatpush.msra.mxu2 %v117_v62  ;;  %v102_v13 = vld [vmem:[#allocation8 + $0x40] sm:$0xff]  ;;  %v224_v14 = vld [vmem:[#allocation9 + $0xb0] sm:$0xff]  ;;  %v231_v15 = vld [vmem:[#allocation9 + $0xe8] sm:$0xff] }
  0x2e   :  { %155 = vmatpush.msra.mxu0 %v100_v43  ;;  %174 = vmatpush.msra.mxu1 %v104_v45  ;;  %v99_v16 = vld [vmem:[#allocation8 + $0x28] sm:$0xff]  ;;  %v221_v17 = vld [vmem:[#allocation9 + $0x98] sm:$0xff]  ;;  %v228_v18 = vld [vmem:[#allocation9 + $0xd0] sm:$0xff] }
  0x2f   :  { %263 = vmatpush.msra.mxu3 %v208_v44  ;;  %191 = vmatpush.msra.mxu2 %v114_v1  ;;  %v96_v19 = vld [vmem:[#allocation8 + $0x10] sm:$0xff]  ;;  %v218_v20 = vld [vmem:[#allocation9 + $0x80] sm:$0xff]  ;;  %v225_v21 = vld [vmem:[#allocation9 + $0xb8] sm:$0xff] }
  0x30   :  { %156 = vmatpush.msra.mxu0 %v97_v47  ;;  %175 = vmatpush.msra.mxu1 %v101_v49  ;;  %v215_v22 = vld [vmem:[#allocation9 + $0x68] sm:$0xff]  ;;  %v222_v23 = vld [vmem:[#allocation9 + $0xa0] sm:$0xff]  ;;  %v212_v24 = vld [vmem:[#allocation9 + $0x50] sm:$0xff] }
  0x31   :  { %264 = vmatpush.msra.mxu3 %v205_v48  ;;  %192 = vmatpush.msra.mxu2 %v111_v4  ;;  %v219_v25 = vld [vmem:[#allocation9 + $0x88] sm:$0xff]  ;;  %v209_v26 = vld [vmem:[#allocation9 + $0x38] sm:$0xff]  ;;  %v216_v27 = vld [vmem:[#allocation9 + $0x70] sm:$0xff] }
  0x32   :  { %157 = vmatpush.msra.mxu0 %v94_v51  ;;  %176 = vmatpush.msra.mxu1 %v98_v55  ;;  %v206_v28 = vld [vmem:[#allocation9 + $0x20] sm:$0xff]  ;;  %v213_v29 = vld [vmem:[#allocation9 + $0x58] sm:$0xff]  ;;  %v203_v30 = vld [vmem:[#allocation9 + $0x8] sm:$0xff] }
  0x33   :  { %265 = vmatpush.msra.mxu3 %v202_v52  ;;  %158 = vmatmul.f32.vlgmr.msra.gmra.mxu0 %v605_v56  ;;  %v210_v31 = vld [vmem:[#allocation9 + $0x40] sm:$0xff]  ;;  %v207_v32 = vld [vmem:[#allocation9 + $0x28] sm:$0xff]  ;;  %v204_v33 = vld [vmem:[#allocation9 + $0x10] sm:$0xff] }
  0x34   :  { %266 = vmatmul.f32.vlgmr.msra.gmra.mxu3 %v603_v53  ;;  %270 = vmatpush.msrb.mxu0 %v248_v54  ;;  %v312_v34 = vld [vmem:[%s630_s4] sm:$0x3] }
  0x35   :  { %177 = vmatpush.msra.mxu1 %v95_v59  ;;  %193 = vmatpush.msra.mxu2 %v108_v7  ;;  %v314_v36 = vperm.slane %v312_v34, 0  ;;  %v315_v46 = vperm.slane %v312_v34, 1  ;;  %v405_v62 = vld [vmem:[%s631_s5] ss:$0 sm:$0xff]  ;;  %s550_s5 = smov [#allocation11]  }
  0x36   :  { %271 = vmatpush.msrb.mxu0 %v245_v57  ;;  %178 = vmatmul.f32.vlgmr.msra.gmra.mxu1 %v605_v56  ;;  %v404_v57 = vld [vmem:[%s632_s6] ss:$0 sm:$0xff]  ;;  %s381_s6 = sshll.u32 %s550_s5, 4  ;;  %s382_s6 = int_to_ptr.vmem [resolvable:$true] %s381_s6 }
  0x37   :  { %290 = vmatpush.msrb.mxu1 %v249_v61  ;;  %194 = vmatpush.msra.mxu2 %v105_v10 }
  0x38   :  { %272 = vmatpush.msrb.mxu0 %v242_v60 }
  0x39   :  { %291 = vmatpush.msrb.mxu1 %v246_v0  ;;  %195 = vmatpush.msra.mxu2 %v102_v13 }
  0x3a   :  { %273 = vmatpush.msrb.mxu0 %v239_v63 }
  0x3b   :  { %292 = vmatpush.msrb.mxu1 %v243_v3  ;;  %196 = vmatpush.msra.mxu2 %v99_v16 }
  0x3c   :  { %274 = vmatpush.msrb.mxu0 %v236_v2 }
  0x3d   :  { %293 = vmatpush.msrb.mxu1 %v240_v6  ;;  %197 = vmatpush.msra.mxu2 %v96_v19 }
  0x3e   :  { %275 = vmatpush.msrb.mxu0 %v233_v5  ;;  %198 = vmatmul.f32.vlgmr.msra.gmra.mxu2 %v605_v56 }
  0x3f   :  { %294 = vmatpush.msrb.mxu1 %v237_v9 }
  0x40   :  { %276 = vmatpush.msrb.mxu0 %v230_v8 }
  0x41   :  { %295 = vmatpush.msrb.mxu1 %v234_v12 }
  0x42   :  { %277 = vmatpush.msrb.mxu0 %v227_v11 }
  0x43   :  { %296 = vmatpush.msrb.mxu1 %v231_v15 }
  0x44   :  { %278 = vmatpush.msrb.mxu0 %v224_v14 }
  0x45   :  { %297 = vmatpush.msrb.mxu1 %v228_v18 }
  0x46   :  { %279 = vmatpush.msrb.mxu0 %v221_v17 }
  0x47   :  { %298 = vmatpush.msrb.mxu1 %v225_v21 }
  0x48   :  { %280 = vmatpush.msrb.mxu0 %v218_v20 }
  0x49   :  { %299 = vmatpush.msrb.mxu1 %v222_v23 }
  0x4a   :  { %281 = vmatpush.msrb.mxu0 %v215_v22 }
  0x4b   :  { %300 = vmatpush.msrb.mxu1 %v219_v25 }
  0x4c   :  { %282 = vmatpush.msrb.mxu0 %v212_v24 }
  0x4d   :  { %301 = vmatpush.msrb.mxu1 %v216_v27 }
  0x4e   :  { %283 = vmatpush.msrb.mxu0 %v209_v26 }
  0x4f   :  { %302 = vmatpush.msrb.mxu1 %v213_v29 }
  0x50   :  { %284 = vmatpush.msrb.mxu0 %v206_v28 }
  0x51   :  { %303 = vmatpush.msrb.mxu1 %v210_v31 }
  0x52   :  { %285 = vmatpush.msrb.mxu0 %v203_v30 }
  0x53   :  { %286 = vmatmul.f32.vlgmr.msrb.gmra.mxu0 %v603_v53  ;;  %304 = vmatpush.msrb.mxu1 %v207_v32 }
  0x55   :  { %305 = vmatpush.msrb.mxu1 %v204_v33 }
  0x56   :  { %306 = vmatmul.f32.vlgmr.msrb.gmra.mxu1 %v603_v53 }
  0xb0   :  { %v159_v35 = vpop.f32.mrf.mxu0 }
  0xb3   :  { %v179_v44 = vpop.f32.mrf.mxu1 }
  0xb7   :  { %v267_v37 = vpop.f32.mrf.mxu3 }
  0xb8   :  { %v310_v38 = vadd.f32 %v267_v37, %v159_v35 }
  0xba   :  { %v318_v39 = vadd.f32 %v314_v36, %v310_v38 }
  0xbc   :  { %v395_v40 = vmul.f32 -1.442695, %v318_v39 }
  0xbe   :  { %406 = vpow2.f32 %v395_v40 }
  0xc1   :  { %v199_v0 = vpop.f32.mrf.mxu2 }
  0xc2   :  { %v362_v4 = vadd.f32 %v405_v62, %v199_v0 }
  0xc4   :  { %v407_v41 = vpop.eup %406 }
  0xc5   :  { %v323_v42 = vadd.f32 1.0, %v407_v41 }
  0xc7   :  { %408 = vrcp.f32 %v323_v42  ;;  %vm329_vm0 = vweird.f32 %v323_v42  ;;  %v335_v52 = vand.u32 2147483648, %v323_v42  ;;  %v333_v55 = vand.u32 2147483647, %v323_v42 }
  0xc9   :  { %v336_v59 = vor.u32 1.1754944e-38, %v335_v52  ;;  %vm334_vm3 = vcmp.eq.f32.partialorder %v333_v55, 8.507059e+37 }
  0xcd   :  { %v409_v43 = vpop.eup %408 }
  0xce   :  { %v325_v45 = vmul.f32 %v409_v43, %v323_v42  ;;  %vm330_vm1 = vweird.f32 %v409_v43 }
  0xcf   :  { %vm331_vm2 = vmor %vm329_vm0, %vm330_vm1 }
  0xd0   :  { %v287_v47 = vpop.f32.mrf.mxu0  ;;  %v326_v48 = vsub.f32 1.0, %v325_v45 }
  0xd1   :  { %v311_v49 = vadd.f32 %v287_v47, %v179_v44 }
  0xd2   :  { %v327_v50 = vmul.f32 %v409_v43, %v326_v48 }
  0xd3   :  { %v319_v51 = vadd.f32 %v315_v46, %v311_v49  ;;  %v307_v58 = vpop.f32.mrf.mxu1 }
  0xd4   :  { %v328_v54 = vadd.f32 %v409_v43, %v327_v50  ;;  %v367_v61 = vadd.f32 %v404_v57, %v307_v58 }
  0xd5   :  { %v396_v56 = vmul.f32 -1.442695, %v319_v51 }
  0xd6   :  { %v332_v60 = vsel %vm331_vm2, %v409_v43, %v328_v54 }
  0xd7   :  { %410 = vpow2.f32 %v396_v56  ;;  %v337_v63 = vsel %vm334_vm3, %v336_v59, %v332_v60 }
  0xd8   :  { %v368_v3 = vmul.f32 %v367_v61, %v337_v63 }
  0xda   :  { %v369_v5 = vadd.f32 %v368_v3, %v362_v4 }
  0xdd   :  { %v411_v1 = vpop.eup %410 }
  0xde   :  { %v342_v2 = vadd.f32 1.0, %v411_v1 }
  0xe0   :  { %412 = vrcp.f32 %v342_v2  ;;  %v354_v9 = vand.u32 2147483648, %v342_v2  ;;  %v352_v11 = vand.u32 2147483647, %v342_v2  ;;  %vm348_vm5 = vweird.f32 %v342_v2 }
  0xe1   :  { %414 = vtanh.f32 %v369_v5 }
  0xe2   :  { %v355_v14 = vor.u32 1.1754944e-38, %v354_v9  ;;  %vm353_vm7 = vcmp.eq.f32.partialorder %v352_v11, 8.507059e+37 }
  0xe6   :  { %v413_v6 = vpop.eup %412 }
  0xe7   :  { %v344_v7 = vmul.f32 %v413_v6, %v342_v2  ;;  %vm349_vm4 = vweird.f32 %v413_v6  ;;  %v415_v12 = vpop.eup %414 }
  0xe8   :  { %vm350_vm6 = vmor %vm348_vm5, %vm349_vm4  ;;  %v371_v16 = vsub.f32 %v603_v53, %v415_v12 }
  0xe9   :  { %v345_v8 = vsub.f32 1.0, %v344_v7 }
  0xeb   :  { %v346_v10 = vmul.f32 %v413_v6, %v345_v8 }
  0xed   :  { %v347_v13 = vadd.f32 %v413_v6, %v346_v10 }
  0xef   :  { %v351_v15 = vsel %vm350_vm6, %v413_v6, %v347_v13 }
  0xf0   :  { %v356_v17 = vsel %vm353_vm7, %v355_v14, %v351_v15 }
  0xf1   :  { %v372_v18 = vmul.f32 %v371_v16, %v356_v17 }
  0xf3   :  { %v373_v19 = vadd.f32 %v415_v12, %v372_v18 }
  0xf5   :  { %375 = vst [vmem:[#allocation11] sm:$0xff] %v373_v19 }
  0xf6   :  { %386 = dma.vmem_to_hbm [thread:$0]  %s382_s6, 128, %s384_s26, [#allocation5]  }
  0xf7   :  { %542 = dma.done.wait [#allocation5], 128  }
  0xf8   :  { %543 = vsyncadd [#allocation5], 4294967168 }
  0xf9   :  { %391 = vsyncpa [#allocation4], 1 }
  0xfa   :  { %392 = vsyncpa [#allocation7], 1 }
  0xfb   :  { %393 = vsyncpa [#allocation10], 1 }
  0xfc   :  { %394 = vsyncpa [#allocation5], 1 }

</bundles_post_ra>
